<compile_context>
chip_gen: v6e
topology: v6e:2x2x1
jax: 0.10.0
libtpu: 0.0.40
codegen_flags: <defaults>
</compile_context>

<pallas_src>
import jax
import jax.numpy as jnp
from jax.experimental import pallas as pl
from jax.experimental.pallas import tpu as pltpu


def _logreg_kernel(x_ref, w_ref, b_ref, o_ref):
    # x_ref: (TB, K) f32, w_ref: (K, N) f32, b_ref: (1, N) f32, o_ref: (TB, N) f32
    x = x_ref[...]
    w = w_ref[...]
    b = b_ref[...]

    # MXU matmul with f32 accumulation, bias broadcast over rows.
    logits = jnp.dot(x, w, preferred_element_type=jnp.float32) + b

    # Stable log-softmax: z - max(z) - log(sum(exp(z - max(z)))).
    # Mathematically identical to log(exp(z)/sum(exp(z))) from the reference.
    m = jnp.max(logits, axis=1, keepdims=True)
    shifted = logits - m
    lse = jnp.log(jnp.sum(jnp.exp(shifted), axis=1, keepdims=True))
    o_ref[...] = shifted - lse


def _round_up(n, m):
    return (n + m - 1) // m * m


def logreg_forward(x_nchw, w, b, *, tile_b=1024):
    """x_nchw: (B, 1, 28, 28) f32; w: (784, 10) f32; b: (10,) f32 -> (B, 10) f32."""
    B = x_nchw.shape[0]
    K, N = w.shape

    # Flatten (torch .view) and cast — no padding, no extra HBM passes.
    x_flat = x_nchw.reshape(B, K).astype(jnp.float32)
    w_f32 = w.astype(jnp.float32)
    b2d = b.reshape(1, N).astype(jnp.float32)

    # Adaptive batch tile:
    #  * ~B/4 rounded up to a multiple of 8 sublanes -> >=4 grid steps so both
    #    v7x TensorCores split the "parallel" axis and tail waste stays <~5%,
    #  * capped at tile_b (1024) so the double-buffered x tile stays small
    #    enough for v5e's 16 MiB default scoped VMEM,
    #  * if the cap meets/exceeds B, use the full batch as a single block
    #    (block dim == full array dim is always legal).
    tb = min(tile_b, max(8, _round_up(pl.cdiv(B, 4), 8)))
    if tb >= B:
        tb = B
    grid_b = pl.cdiv(B, tb)

    cost = pl.CostEstimate(
        flops=2 * B * K * N,
        transcendentals=B * (N + 1),                      # B*N exps + B logs
        bytes_accessed=(B * K + K * N + N + B * N) * 4,   # true, unpadded traffic
    )

    out = pl.pallas_call(
        _logreg_kernel,
        out_shape=jax.ShapeDtypeStruct((B, N), jnp.float32),
        grid_spec=pltpu.PrefetchScalarGridSpec(
            num_scalar_prefetch=0,
            grid=(grid_b,),
            in_specs=[
                pl.BlockSpec((tb, K), lambda i: (i, 0)),   # x tile, streamed
                pl.BlockSpec((K, N), lambda i: (0, 0)),    # W, VMEM-resident
                pl.BlockSpec((1, N), lambda i: (0, 0)),    # b, VMEM-resident
            ],
            out_specs=pl.BlockSpec((tb, N), lambda i: (i, 0)),
        ),
        compiler_params=pltpu.CompilerParams(
            dimension_semantics=("parallel",),
        ),
        cost_estimate=cost,
    )(x_flat, w_f32, b2d)

    return out


def _reference(x_nchw, w, b):
    x = x_nchw.reshape(x_nchw.shape[0], -1)
    logits = x @ w + b
    e = jnp.exp(logits)
    return jnp.log(e / jnp.sum(e, axis=1, keepdims=True))


if __name__ == "__main__":
    key = jax.random.PRNGKey(0)
    k_x, k_w, k_b = jax.random.split(key, 3)

    B = 8
    IN = 28 * 28
    OUT = 10

    # Deterministic parameter init mirroring get_weights: randn(dims) / dims[0]
    w = jax.random.normal(k_w, (IN, OUT), dtype=jnp.float32) / IN
    b = jax.random.normal(k_b, (OUT,), dtype=jnp.float32) / OUT

    # Synthetic MNIST-like batch in NCHW, normalized like the preamble:
    # (x - mean) / std over the whole tensor.
    x = jax.random.normal(k_x, (B, 1, 28, 28), dtype=jnp.float32)
    x = (x - x.mean()) / x.std()

    out = logreg_forward(x, w, b)
    out = jax.block_until_ready(out)

    ref = _reference(x, w, b)
    assert out.shape == (B, OUT), out.shape
    assert jnp.allclose(out, ref, atol=1e-5, rtol=1e-5), "mismatch vs reference"

    print("KERNEL_OK")
</pallas_src>

<mosaic_0001>
module attributes {stable_mosaic.version = 11 : i64} {
  func.func @_logreg_kernel(%arg0: i32, %arg1: memref<8x784xf32, #tpu.memory_space<vmem>>, %arg2: memref<784x10xf32, #tpu.memory_space<vmem>>, %arg3: memref<1x10xf32, #tpu.memory_space<vmem>>, %arg4: memref<8x10xf32, #tpu.memory_space<vmem>>) attributes {dimension_semantics = [#tpu.dimension_semantics<parallel>], iteration_bounds = array<i64: 1>, scalar_prefetch = 0 : i64, scratch_operands = 0 : i64, tpu.core_type = #tpu.core_type<tc>, window_params = [{transform_indices = @transform_0, window_bounds = array<i64: 8, 784>}, {pipeline_mode = #tpu.pipeline_mode<synchronous>, transform_indices = @transform_1, window_bounds = array<i64: 784, 10>}, {pipeline_mode = #tpu.pipeline_mode<synchronous>, transform_indices = @transform_2, window_bounds = array<i64: 1, 10>}, {transform_indices = @transform_3, window_bounds = array<i64: 8, 10>}]} {
    %c0 = arith.constant 0 : index
    %c0_0 = arith.constant 0 : index
    %0 = vector.load %arg1[%c0, %c0_0] : memref<8x784xf32, #tpu.memory_space<vmem>>, vector<8x784xf32>
    %c0_1 = arith.constant 0 : index
    %c0_2 = arith.constant 0 : index
    %1 = vector.load %arg2[%c0_1, %c0_2] : memref<784x10xf32, #tpu.memory_space<vmem>>, vector<784x10xf32>
    %c0_3 = arith.constant 0 : index
    %c0_4 = arith.constant 0 : index
    %2 = vector.load %arg3[%c0_3, %c0_4] : memref<1x10xf32, #tpu.memory_space<vmem>>, vector<1x10xf32>
    %cst = arith.constant dense<0.000000e+00> : vector<8x10xf32>
    %3 = tpu.matmul %0, %1, %cst {dimension_numbers = #tpu.dot_dimension_numbers<[1], [0], [0], [1], [0, 0, 1, 1], [], []>} : vector<8x784xf32>, vector<784x10xf32>, vector<8x10xf32> -> vector<8x10xf32>
    %4 = vector.broadcast %2 : vector<1x10xf32> to vector<8x10xf32>
    %5 = arith.addf %3, %4 : vector<8x10xf32>
    %cst_5 = arith.constant dense<0xFF800000> : vector<8xf32>
    %6 = vector.multi_reduction <maximumf>, %5, %cst_5 [1] : vector<8x10xf32> to vector<8xf32>
    %7 = vector.shape_cast %6 : vector<8xf32> to vector<8x1xf32>
    %8 = vector.broadcast %7 : vector<8x1xf32> to vector<8x10xf32>
    %9 = arith.subf %5, %8 : vector<8x10xf32>
    %10 = math.exp %9 : vector<8x10xf32>
    %cst_6 = arith.constant dense<0.000000e+00> : vector<8xf32>
    %11 = vector.multi_reduction <add>, %10, %cst_6 [1] : vector<8x10xf32> to vector<8xf32>
    %12 = vector.shape_cast %11 : vector<8xf32> to vector<8x1xf32>
    %13 = math.log %12 : vector<8x1xf32>
    %14 = vector.broadcast %13 : vector<8x1xf32> to vector<8x10xf32>
    %15 = arith.subf %9, %14 : vector<8x10xf32>
    %c0_7 = arith.constant 0 : index
    %c0_8 = arith.constant 0 : index
    %16 = vector.load %arg4[%c0_7, %c0_8] : memref<8x10xf32, #tpu.memory_space<vmem>>, vector<8x10xf32>
    tpu.vector_store %arg4[%c0_7, %c0_8], %15 {strides = array<i32>} : memref<8x10xf32, #tpu.memory_space<vmem>>, vector<8x10xf32>,
    return
  }
  func.func @transform_0(%arg0: i32) -> (i32, i32) {
    %c0_i32 = arith.constant 0 : i32
    %c0_i32_0 = arith.constant 0 : i32
    return %arg0, %c0_i32 : i32, i32
  }
  func.func @transform_1(%arg0: i32) -> (i32, i32) {
    %c0_i32 = arith.constant 0 : i32
    %c0_i32_0 = arith.constant 0 : i32
    %c0_i32_1 = arith.constant 0 : i32
    return %c0_i32, %c0_i32_0 : i32, i32
  }
  func.func @transform_2(%arg0: i32) -> (i32, i32) {
    %c0_i32 = arith.constant 0 : i32
    %c0_i32_0 = arith.constant 0 : i32
    %c0_i32_1 = arith.constant 0 : i32
    return %c0_i32, %c0_i32_0 : i32, i32
  }
  func.func @transform_3(%arg0: i32) -> (i32, i32) {
    %c0_i32 = arith.constant 0 : i32
    %c0_i32_0 = arith.constant 0 : i32
    return %arg0, %c0_i32 : i32, i32
  }
}

</mosaic_0001>

<bundles_post_ra>
// kernel: tpu_custom_call.1
= control target key start
LH: loop header
LB: loop body
LE: loop exit
PB: predicated region body
PF: predicated region fallthrough
CT: control target
= control target key end

     0   :  { %s932_s0 = inlined_call_operand.vmem [shape: f32[8,784], index: 0, kind: input, shape index: {}]   ;;  %s933_s1 = inlined_call_operand.vmem [shape: f32[784,10], index: 1, kind: input, shape index: {}]   ;;  %s934_s2 = inlined_call_operand.vmem [shape: f32[1,10], index: 2, kind: input, shape index: {}]   ;;  %s935_s3 = inlined_call_operand.hbm [shape: f32[8,10], index: 3, kind: output, shape index: {}]  }
   0x1   :  { %v53_v0 = vld [vmem:[%s933_s1 + $0xf8] sm:$0xff]  ;;  %v52_v2 = vld [vmem:[%s933_s1 + $0xf0] sm:$0xff]  ;;  %v51_v6 = vld [vmem:[%s933_s1 + $0xe8] sm:$0xff] }
   0x2   :  { %v37_v1 = vld [vmem:[%s933_s1 + $0x78] sm:$0xff]  ;;  %441 = vmatprep.subr.mxu0 %v53_v0  ;;  %v36_v4 = vld [vmem:[%s933_s1 + $0x70] sm:$0xff]  ;;  %v35_v8 = vld [vmem:[%s933_s1 + $0x68] sm:$0xff] }
   0x3   :  { %v85_v3 = vld [vmem:[%s933_s1 + $0x1f8] sm:$0xff]  ;;  %442 = vmatpush3.msra.mxu0 %v37_v1  ;;  %v84_v7 = vld [vmem:[%s933_s1 + $0x1f0] sm:$0xff]  ;;  %v83_v10 = vld [vmem:[%s933_s1 + $0x1e8] sm:$0xff] }
   0x4   :  { %v69_v5 = vld [vmem:[%s933_s1 + $0x178] sm:$0xff]  ;;  %476 = vmatprep.subr.mxu1 %v85_v3  ;;  %443 = vmatprep.subr.mxu0 %v52_v2  ;;  %v68_v9 = vld [vmem:[%s933_s1 + $0x170] sm:$0xff]  ;;  %v50_v11 = vld [vmem:[%s933_s1 + $0xe0] sm:$0xff] }
   0x5   :  { %477 = vmatpush3.msra.mxu1 %v69_v5  ;;  %444 = vmatpush3.msra.mxu0 %v36_v4  ;;  %v67_v12 = vld [vmem:[%s933_s1 + $0x168] sm:$0xff]  ;;  %v34_v13 = vld [vmem:[%s933_s1 + $0x60] sm:$0xff]  ;;  %v49_v15 = vld [vmem:[%s933_s1 + $0xd8] sm:$0xff] }
   0x6   :  { %478 = vmatprep.subr.mxu1 %v84_v7  ;;  %445 = vmatprep.subr.mxu0 %v51_v6  ;;  %v82_v14 = vld [vmem:[%s933_s1 + $0x1e0] sm:$0xff]  ;;  %v33_v17 = vld [vmem:[%s933_s1 + $0x58] sm:$0xff]  ;;  %v48_v19 = vld [vmem:[%s933_s1 + $0xd0] sm:$0xff] }
   0x7   :  { %479 = vmatpush3.msra.mxu1 %v68_v9  ;;  %446 = vmatpush3.msra.mxu0 %v35_v8  ;;  %v66_v16 = vld [vmem:[%s933_s1 + $0x160] sm:$0xff]  ;;  %v81_v18 = vld [vmem:[%s933_s1 + $0x1d8] sm:$0xff]  ;;  %v32_v21 = vld [vmem:[%s933_s1 + $0x50] sm:$0xff] }
   0x8   :  { %480 = vmatprep.subr.mxu1 %v83_v10  ;;  %447 = vmatprep.subr.mxu0 %v50_v11  ;;  %v65_v20 = vld [vmem:[%s933_s1 + $0x158] sm:$0xff]  ;;  %v80_v22 = vld [vmem:[%s933_s1 + $0x1d0] sm:$0xff]  ;;  %v47_v23 = vld [vmem:[%s933_s1 + $0xc8] sm:$0xff] }
   0x9   :  { %481 = vmatpush3.msra.mxu1 %v67_v12  ;;  %448 = vmatpush3.msra.mxu0 %v34_v13  ;;  %v64_v24 = vld [vmem:[%s933_s1 + $0x150] sm:$0xff]  ;;  %v31_v25 = vld [vmem:[%s933_s1 + $0x48] sm:$0xff]  ;;  %v46_v27 = vld [vmem:[%s933_s1 + $0xc0] sm:$0xff] }
   0xa   :  { %482 = vmatprep.subr.mxu1 %v82_v14  ;;  %449 = vmatprep.subr.mxu0 %v49_v15  ;;  %v79_v26 = vld [vmem:[%s933_s1 + $0x1c8] sm:$0xff]  ;;  %v30_v29 = vld [vmem:[%s933_s1 + $0x40] sm:$0xff]  ;;  %v45_v31 = vld [vmem:[%s933_s1 + $0xb8] sm:$0xff] }
   0xb   :  { %483 = vmatpush3.msra.mxu1 %v66_v16  ;;  %450 = vmatpush3.msra.mxu0 %v33_v17  ;;  %v63_v28 = vld [vmem:[%s933_s1 + $0x148] sm:$0xff]  ;;  %v78_v30 = vld [vmem:[%s933_s1 + $0x1c0] sm:$0xff]  ;;  %v29_v33 = vld [vmem:[%s933_s1 + $0x38] sm:$0xff] }
   0xc   :  { %484 = vmatprep.subr.mxu1 %v81_v18  ;;  %451 = vmatprep.subr.mxu0 %v48_v19  ;;  %v62_v32 = vld [vmem:[%s933_s1 + $0x140] sm:$0xff]  ;;  %v77_v34 = vld [vmem:[%s933_s1 + $0x1b8] sm:$0xff]  ;;  %v44_v35 = vld [vmem:[%s933_s1 + $0xb0] sm:$0xff] }
   0xd   :  { %485 = vmatpush3.msra.mxu1 %v65_v20  ;;  %452 = vmatpush3.msra.mxu0 %v32_v21  ;;  %v61_v36 = vld [vmem:[%s933_s1 + $0x138] sm:$0xff]  ;;  %v28_v37 = vld [vmem:[%s933_s1 + $0x30] sm:$0xff]  ;;  %v43_v39 = vld [vmem:[%s933_s1 + $0xa8] sm:$0xff] }
   0xe   :  { %486 = vmatprep.subr.mxu1 %v80_v22  ;;  %453 = vmatprep.subr.mxu0 %v47_v23  ;;  %v76_v38 = vld [vmem:[%s933_s1 + $0x1b0] sm:$0xff]  ;;  %v27_v41 = vld [vmem:[%s933_s1 + $0x28] sm:$0xff]  ;;  %v42_v43 = vld [vmem:[%s933_s1 + $0xa0] sm:$0xff] }
   0xf   :  { %487 = vmatpush3.msra.mxu1 %v64_v24  ;;  %454 = vmatpush3.msra.mxu0 %v31_v25  ;;  %v60_v40 = vld [vmem:[%s933_s1 + $0x130] sm:$0xff]  ;;  %v75_v42 = vld [vmem:[%s933_s1 + $0x1a8] sm:$0xff]  ;;  %v26_v45 = vld [vmem:[%s933_s1 + $0x20] sm:$0xff] }
  0x10   :  { %488 = vmatprep.subr.mxu1 %v79_v26  ;;  %455 = vmatprep.subr.mxu0 %v46_v27  ;;  %v59_v44 = vld [vmem:[%s933_s1 + $0x128] sm:$0xff]  ;;  %v74_v46 = vld [vmem:[%s933_s1 + $0x1a0] sm:$0xff]  ;;  %v41_v47 = vld [vmem:[%s933_s1 + $0x98] sm:$0xff] }
  0x11   :  { %489 = vmatpush3.msra.mxu1 %v63_v28  ;;  %456 = vmatpush3.msra.mxu0 %v30_v29  ;;  %v58_v48 = vld [vmem:[%s933_s1 + $0x120] sm:$0xff]  ;;  %v25_v49 = vld [vmem:[%s933_s1 + $0x18] sm:$0xff]  ;;  %v40_v51 = vld [vmem:[%s933_s1 + $0x90] sm:$0xff] }
  0x12   :  { %490 = vmatprep.subr.mxu1 %v78_v30  ;;  %457 = vmatprep.subr.mxu0 %v45_v31  ;;  %v73_v50 = vld [vmem:[%s933_s1 + $0x198] sm:$0xff]  ;;  %v24_v53 = vld [vmem:[%s933_s1 + $0x10] sm:$0xff]  ;;  %v39_v55 = vld [vmem:[%s933_s1 + $0x88] sm:$0xff] }
  0x13   :  { %491 = vmatpush3.msra.mxu1 %v62_v32  ;;  %458 = vmatpush3.msra.mxu0 %v29_v33  ;;  %v57_v52 = vld [vmem:[%s933_s1 + $0x118] sm:$0xff]  ;;  %v72_v54 = vld [vmem:[%s933_s1 + $0x190] sm:$0xff]  ;;  %v23_v57 = vld [vmem:[%s933_s1 + $0x8] sm:$0xff] }
  0x14   :  { %492 = vmatprep.subr.mxu1 %v77_v34  ;;  %459 = vmatprep.subr.mxu0 %v44_v35  ;;  %v56_v56 = vld [vmem:[%s933_s1 + $0x110] sm:$0xff]  ;;  %v71_v58 = vld [vmem:[%s933_s1 + $0x188] sm:$0xff]  ;;  %v38_v59 = vld [vmem:[%s933_s1 + $0x80] sm:$0xff] }
  0x15   :  { %493 = vmatpush3.msra.mxu1 %v61_v36  ;;  %460 = vmatpush3.msra.mxu0 %v28_v37  ;;  %v16_v60 = vld [vmem:[%s932_s0 + $0x8] sm:$0xff]  ;;  %v22_v61 = vld [vmem:[%s933_s1] sm:$0xff]  ;;  %v117_v1 = vld [vmem:[%s933_s1 + $0x2f8] sm:$0xff] }
  0x16   :  { %494 = vmatprep.subr.mxu1 %v76_v38  ;;  %461 = vmatprep.subr.mxu0 %v43_v39  ;;  %v55_v62 = vld [vmem:[%s933_s1 + $0x108] sm:$0xff]  ;;  %v15_v63 = vld [vmem:[%s932_s0] sm:$0xff]  ;;  %v18_v3 = vld [vmem:[%s932_s0 + $0x18] sm:$0xff] }
  0x17   :  { %495 = vmatpush3.msra.mxu1 %v60_v40  ;;  %462 = vmatpush3.msra.mxu0 %v27_v41  ;;  %v70_v0 = vld [vmem:[%s933_s1 + $0x180] sm:$0xff]  ;;  %v101_v4 = vld [vmem:[%s933_s1 + $0x278] sm:$0xff]  ;;  %v17_v5 = vld [vmem:[%s932_s0 + $0x10] sm:$0xff] }
  0x18   :  { %496 = vmatprep.subr.mxu1 %v75_v42  ;;  %463 = vmatprep.subr.mxu0 %v42_v43  ;;  %v54_v2 = vld [vmem:[%s933_s1 + $0x100] sm:$0xff]  ;;  %v116_v6 = vld [vmem:[%s933_s1 + $0x2f0] sm:$0xff]  ;;  %v20_v8 = vld [vmem:[%s932_s0 + $0x28] sm:$0xff] }
  0x19   :  { %497 = vmatpush3.msra.mxu1 %v59_v44  ;;  %464 = vmatpush3.msra.mxu0 %v26_v45  ;;  %v100_v7 = vld [vmem:[%s933_s1 + $0x270] sm:$0xff]  ;;  %v115_v9 = vld [vmem:[%s933_s1 + $0x2e8] sm:$0xff] }
  0x1a   :  { %498 = vmatprep.subr.mxu1 %v74_v46  ;;  %465 = vmatprep.subr.mxu0 %v41_v47 }
  0x1b   :  { %499 = vmatpush3.msra.mxu1 %v58_v48  ;;  %466 = vmatpush3.msra.mxu0 %v25_v49 }
  0x1c   :  { %500 = vmatprep.subr.mxu1 %v73_v50  ;;  %467 = vmatprep.subr.mxu0 %v40_v51 }
  0x1d   :  { %501 = vmatpush3.msra.mxu1 %v57_v52  ;;  %468 = vmatpush3.msra.mxu0 %v24_v53 }
  0x1e   :  { %502 = vmatprep.subr.mxu1 %v72_v54  ;;  %469 = vmatprep.subr.mxu0 %v39_v55 }
  0x1f   :  { %503 = vmatpush3.msra.mxu1 %v56_v56  ;;  %470 = vmatpush3.msra.mxu0 %v23_v57 }
  0x20   :  { %504 = vmatprep.subr.mxu1 %v71_v58  ;;  %471 = vmatprep.subr.mxu0 %v38_v59 }
  0x21   :  { %195 = vmatprep.mubr.f32.mxu0 %v16_v60  ;;  %472 = vmatpush3.msra.mxu0 %v22_v61 }
  0x22   :  { %505 = vmatpush3.msra.mxu1 %v55_v62  ;;  %196 = vmatmul.mubr.f32.vlgmr.msra.gmra.mxu0 %v15_v63 }
  0x23   :  { %506 = vmatprep.subr.mxu1 %v70_v0  ;;  %511 = vmatprep.subr.mxu0 %v117_v1 }
  0x24   :  { %507 = vmatpush3.msra.mxu1 %v54_v2  ;;  %265 = vmatprep.mubr.f32.mxu1 %v18_v3 }
  0x25   :  { %512 = vmatpush3.msra.mxu0 %v101_v4 }
  0x26   :  { %8 = vsyncpa [#allocation3], 0  ;;  %266 = vmatmul.mubr.f32.vlgmr.msra.gmra.mxu1 %v17_v5  ;;  %513 = vmatprep.subr.mxu0 %v116_v6  ;;  %v99_v10 = vld [vmem:[%s933_s1 + $0x268] sm:$0xff]  ;;  %v114_v12 = vld [vmem:[%s933_s1 + $0x2e0] sm:$0xff]  ;;  %v585_v14 = vmov 0.0   ;;  %vm127_vm0 = vcmask 130048  }
  0x27   :  { %v119_v11 = vld [vmem:[%s933_s1 + $0x308] sm:$0xff]  ;;  %514 = vmatpush3.msra.mxu0 %v100_v7  ;;  %335 = vmatprep.mubr.f32.mxu0 %v20_v8  ;;  %v98_v13 = vld [vmem:[%s933_s1 + $0x260] sm:$0xff]  ;;  %v113_v16 = vld [vmem:[%s933_s1 + $0x2d8] sm:$0xff]  ;;  %vm586_vm1 = vmmov 0   ;;  %vm411_vm2 = vcmask 80896  }
  0x28   :  { %515 = vmatprep.subr.mxu0 %v115_v9  ;;  %549 = vmatprep.subr.mxu1 %v585_v14  ;;  %v118_v15 = vld [vmem:[%s933_s1 + $0x300] sm:$0xff]  ;;  %v97_v17 = vld [vmem:[%s933_s1 + $0x258] sm:$0xff]  ;;  %v21_v18 = vld [vmem:[%s932_s0 + $0x30] sm:$0xff] }
  0x29   :  { %516 = vmatpush3.msra.mxu0 %v99_v10  ;;  %550 = vmatpush3.msra.mxu1 %v119_v11  ;;  %v112_v19 = vld [vmem:[%s933_s1 + $0x2d0] sm:$0xff]  ;;  %v111_v21 = vld [vmem:[%s933_s1 + $0x2c8] sm:$0xff]  ;;  %v110_v23 = vld [vmem:[%s933_s1 + $0x2c0] sm:$0xff] }
  0x2a   :  { %517 = vmatprep.subr.mxu0 %v114_v12  ;;  %551 = vmatprep.subr.mxu1 %v585_v14  ;;  %v96_v20 = vld [vmem:[%s933_s1 + $0x250] sm:$0xff]  ;;  %v95_v22 = vld [vmem:[%s933_s1 + $0x248] sm:$0xff]  ;;  %v94_v24 = vld [vmem:[%s933_s1 + $0x240] sm:$0xff] }
  0x2b   :  { %518 = vmatpush3.msra.mxu0 %v98_v13  ;;  %552 = vmatpush3.msra.mxu1 %v118_v15  ;;  %v109_v25 = vld [vmem:[%s933_s1 + $0x2b8] sm:$0xff]  ;;  %v108_v27 = vld [vmem:[%s933_s1 + $0x2b0] sm:$0xff]  ;;  %v107_v29 = vld [vmem:[%s933_s1 + $0x2a8] sm:$0xff] }
  0x2c   :  { %519 = vmatprep.subr.mxu0 %v113_v16  ;;  %553 = vmatprep.mubr.msk.f32.mxu1 %vm586_vm1, %v585_v14  ;;  %v93_v26 = vld [vmem:[%s933_s1 + $0x238] sm:$0xff]  ;;  %v92_v28 = vld [vmem:[%s933_s1 + $0x230] sm:$0xff]  ;;  %v91_v30 = vld [vmem:[%s933_s1 + $0x228] sm:$0xff] }
  0x2d   :  { %520 = vmatpush3.msra.mxu0 %v97_v17  ;;  %554 = vmatmul.mubr.msk.f32.vlgmr.msra.gmra.mxu1 %vm127_vm0, %v21_v18  ;;  %v106_v31 = vld [vmem:[%s933_s1 + $0x2a0] sm:$0xff]  ;;  %v105_v33 = vld [vmem:[%s933_s1 + $0x298] sm:$0xff]  ;;  %v104_v35 = vld [vmem:[%s933_s1 + $0x290] sm:$0xff] }
  0x2e   :  { %521 = vmatprep.subr.mxu0 %v112_v19  ;;  %v90_v32 = vld [vmem:[%s933_s1 + $0x220] sm:$0xff]  ;;  %v89_v34 = vld [vmem:[%s933_s1 + $0x218] sm:$0xff]  ;;  %v88_v36 = vld [vmem:[%s933_s1 + $0x210] sm:$0xff] }
  0x2f   :  { %522 = vmatpush3.msra.mxu0 %v96_v20  ;;  %v103_v37 = vld [vmem:[%s933_s1 + $0x288] sm:$0xff]  ;;  %v102_v39 = vld [vmem:[%s933_s1 + $0x280] sm:$0xff] }
  0x30   :  { %523 = vmatprep.subr.mxu0 %v111_v21  ;;  %v87_v38 = vld [vmem:[%s933_s1 + $0x208] sm:$0xff]  ;;  %v86_v40 = vld [vmem:[%s933_s1 + $0x200] sm:$0xff] }
  0x31   :  { %524 = vmatpush3.msra.mxu0 %v95_v22  ;;  %v19_v41 = vld [vmem:[%s932_s0 + $0x20] sm:$0xff]  ;;  %s587_s0 = smov [#allocation2]  }
  0x32   :  { %525 = vmatprep.subr.mxu0 %v110_v23  ;;  %v439_v49 = vld [vmem:[%s934_s2] ss:$0 sm:$0xff]  ;;  %s431_s1 = sshll.u32 %s587_s0, 4  ;;  %s432_s1 = int_to_ptr.vmem [resolvable:$true] %s431_s1 }
  0x33   :  { %526 = vmatpush3.msra.mxu0 %v94_v24  ;;  %s563_s2 = scalar_lea.vmem %s432_s1, 128  ;;  %p568_p1 = scmp.lt.s32.totalorder %s432_s1, %s432_s1 }
  0x34   :  { %527 = vmatprep.subr.mxu0 %v109_v25  ;;  %p564_p0 = scmp.ne.s32.totalorder %s432_s1, %s563_s2  ;;  %p569_p2 = scmp.lt.s32.totalorder %s563_s2, %s563_s2 }
  0x35   :  { %528 = vmatpush3.msra.mxu0 %v93_v26 }
  0x36   :  { %529 = vmatprep.subr.mxu0 %v108_v27  ;;  %p570_p3 = por %p569_p2, %p568_p1 }
  0x37   :  { %530 = vmatpush3.msra.mxu0 %v92_v28 }
  0x38   :  { %531 = vmatprep.subr.mxu0 %v107_v29  ;;  %p571_p4 = pnand %p570_p3, %p564_p0 }
  0x39   :  { %532 = vmatpush3.msra.mxu0 %v91_v30 }
  0x3a   :  { %533 = vmatprep.subr.mxu0 %v106_v31 }
  0x3b   :  { %534 = vmatpush3.msra.mxu0 %v90_v32 }
  0x3c   :  { %535 = vmatprep.subr.mxu0 %v105_v33 }
  0x3d   :  { %536 = vmatpush3.msra.mxu0 %v89_v34 }
  0x3e   :  { %537 = vmatprep.subr.mxu0 %v104_v35 }
  0x3f   :  { %538 = vmatpush3.msra.mxu0 %v88_v36 }
  0x40   :  { %539 = vmatprep.subr.mxu0 %v103_v37 }
  0x41   :  { %540 = vmatpush3.msra.mxu0 %v87_v38 }
  0x42   :  { %541 = vmatprep.subr.mxu0 %v102_v39 }
  0x43   :  { %542 = vmatpush3.msra.mxu0 %v86_v40 }
  0x44   :  { %336 = vmatmul.mubr.f32.vlgmr.msra.gmra.mxu0 %v19_v41 }
  0xe2   :  { %v473_v46 = vpop.f32.mrf.mxu0 }
  0xe4   :  { %v474_v47 = vpop.f32.mrf.mxu0 }
  0xe5   :  { %v475_v48 = vadd.f32 %v474_v47, %v473_v46 }
  0xe6   :  { %v508_v42 = vpop.f32.mrf.mxu1 }
  0xe7   :  { %v198_v50 = vadd.f32 %v475_v48, %v439_v49 }
  0xe8   :  { %v509_v43 = vpop.f32.mrf.mxu1 }
  0xe9   :  { %v510_v51 = vadd.f32 %v509_v43, %v508_v42 }
  0xeb   :  { %v268_v54 = vadd.f32 %v510_v51, %v198_v50 }
  0xed   :  { %v407_v44 = vpop.f32.mrf.mxu1 }
  0xef   :  { %v555_v45 = vpop.f32.mrf.mxu1 }
 0x104   :  { %v543_v52 = vpop.f32.mrf.mxu0 }
 0x106   :  { %v544_v53 = vpop.f32.mrf.mxu0 }
 0x107   :  { %v545_v55 = vadd.f32 %v544_v53, %v543_v52 }
 0x109   :  { %v338_v56 = vadd.f32 %v545_v55, %v268_v54 }
 0x10b   :  { %v408_v57 = vadd.f32 %v407_v44, %v338_v56 }
 0x10d   :  { %v412_v58 = vsel %vm411_vm2, %v408_v57, -inf }
 0x10e   :  { %413 = vmax.xlane.f32.xlu0 %v412_v58 }
 0x197   :  { %v414_v59 = vpop.xlane.xlu0 %413 }
 0x198   :  { %v415_v60 = vsub.f32 %v408_v57, %v414_v59 }
 0x19a   :  { %v416_v61 = vmul.f32 1.442695, %v415_v60 }
 0x19c   :  { %559 = vpow2.f32 %v416_v61 }
 0x1a9   :  { %v560_v62 = vpop.eup %559 }
 0x1aa   :  { %v418_v63 = vsel %vm411_vm2, %v560_v62, 0.0 }
 0x1ab   :  { %419 = vadd.xlane.f32.xlu0 %v418_v63 }
 0x234   :  { %v420_v0 = vpop.xlane.xlu0 %419 }
 0x235   :  { %561 = vlog2.f32 %v420_v0 }
 0x242   :  { %v562_v1 = vpop.eup %561 }
 0x243   :  { %v422_v2 = vmul.f32 0.6931472, %v562_v1 }
 0x245   :  { %v423_v3 = vsub.f32 %v415_v60, %v422_v2 }
 0x247   :  { %424 = vst.msk [vmem:[#allocation2] sm:$0xff] %vm411_vm2, %v423_v3 }
 0x248   :  { %574 = shalt.err (!%p571_p4)
}
 0x249   :  { %434 = dma.vmem_to_hbm [thread:$0]  %s432_s1, 128, %s935_s3, [#allocation3]  }
 0x24a   :  { %583 = dma.done.wait [#allocation3], 128  }
 0x24b   :  { %584 = vsyncadd [#allocation3], 4294967168 }
 0x24c   :  { %438 = vsyncpa [#allocation3], 1 }

</bundles_post_ra>
